<compile_context>
chip_gen: v5e
topology: v5e:2x2
jax: 0.10.0
libtpu: 0.0.40
codegen_flags: <defaults>
</compile_context>

<pallas_src>
import functools

import jax
import jax.numpy as jnp
from jax.experimental import pallas as pl
from jax.experimental.pallas import tpu as pltpu


def _round_up(x, m):
    return (x + m - 1) // m * m


def _pick_tile(n, candidates):
    for c in candidates:
        if n % c == 0:
            return c
    return n


# ----------------------------------------------------------------------------
# Kernel 1: tiled per-batch pairwise squared distances
#   D[b, i, j] = (x_i - x_j)^2 + (y_i - y_j)^2 + (z_i - z_j)^2
# Row points arrive point-major (T, 3); column points arrive channel-major
# (3, T) so every broadcast/output is lane-dense. Pure VPU work, hidden under
# the HBM writeback of the (T, T) tile.
# ----------------------------------------------------------------------------
def _sqdist_kernel(pr_ref, pc_ref, d_ref):
    pi = pr_ref[0].astype(jnp.float32)            # (TM, 3) point-major rows
    pj = pc_ref[0].astype(jnp.float32)            # (3, TN) channel-major cols
    dx = pi[:, 0:1] - pj[0:1, :]                  # (TM, TN) VPU broadcast
    dy = pi[:, 1:2] - pj[1:2, :]
    dz = pi[:, 2:3] - pj[2:3, :]
    d_ref[0] = dx * dx + dy * dy + dz * dz        # exact, >= 0, no clamp needed


def pairwise_sqdist(pc, pad_value=1.0e6):
    """pc: (B, N, 3) -> (B, N, Np) squared distances (padded cols are huge)."""
    B, N, C = pc.shape
    assert C == 3
    Np = _round_up(N, 128)
    if Np != N:
        # pad with far-away points so they are never selected as neighbors
        pc = jnp.pad(pc, ((0, 0), (0, Np - N), (0, 0)), constant_values=pad_value)
    # Large tiles amortize per-step pipeline overhead; 1024 keeps the f32
    # output block at 4 MiB (8 MiB double-buffered) — within the default
    # scoped VMEM limit on every generation including v7x.
    tile = _pick_tile(Np, (1024, 512, 256, 128))
    pc_cm = jnp.transpose(pc, (0, 2, 1))          # (B, 3, Np), tiny plumbing

    d2 = pl.pallas_call(
        _sqdist_kernel,
        out_shape=jax.ShapeDtypeStruct((B, Np, Np), jnp.float32),
        grid=(B, Np // tile, Np // tile),
        in_specs=[
            pl.BlockSpec((1, tile, 3), lambda b, i, j: (b, i, 0)),
            pl.BlockSpec((1, 3, tile), lambda b, i, j: (b, 0, j)),
        ],
        out_specs=pl.BlockSpec((1, tile, tile), lambda b, i, j: (b, i, j)),
        compiler_params=pltpu.CompilerParams(
            dimension_semantics=("parallel", "parallel", "parallel")),
    )(pc, pc_cm)
    # TODO(synk): for large N, fuse per-column-tile partial top-k / radius
    # counting into this kernel instead of materializing the full (B, N, Np)
    # f32 matrix (largest remaining structural lever).
    return d2[:, :N, :]


# ----------------------------------------------------------------------------
# Kernel 2: fully parallel fused loss partial reduction
#   per (b, tile): sum|pred - gt|, sum||flow - knn_flow||_p, sum||flow - ball||_p
# Inputs are channel-major with N (padded to a multiple of the tile) on the
# lane axis; padded columns are zeros so they contribute 0 to every sum.
# Each grid step writes an (8,128) slab: lane 0 = data, 1 = knn, 2 = ball.
# ----------------------------------------------------------------------------
def _loss_kernel(pred_ref, gt_ref, nn_ref, out_ref, *,
                 k_knn, loss_norm_knn, loss_norm_ball):
    pred = pred_ref[0].astype(jnp.float32)        # (3, T)
    gt = gt_ref[0].astype(jnp.float32)            # (3, T)
    nn = nn_ref[0].astype(jnp.float32)            # (3, Ktot, T), bf16 in HBM

    # torch.nn.L1Loss(reduction='mean') numerator
    sum_data = jnp.sum(jnp.abs(pred - gt))

    diff = nn - pred[:, None, :]                  # (3, Ktot, T)

    def _norm_sum(d, p):
        if p == 1:
            return jnp.sum(jnp.abs(d))
        return jnp.sum(jnp.sqrt(jnp.sum(d * d, axis=0)))

    # NOTE: k_knn should stay a multiple of 8 so this sublane slice is aligned
    # (true for the current config k=8).
    sum_knn = _norm_sum(diff[:, :k_knn, :], loss_norm_knn)
    sum_ball = _norm_sum(diff[:, k_knn:, :], loss_norm_ball)

    lane = jax.lax.broadcasted_iota(jnp.int32, (8, 128), 1)
    out_ref[0, 0] = (jnp.where(lane == 0, sum_data, 0.0)
                     + jnp.where(lane == 1, sum_knn, 0.0)
                     + jnp.where(lane == 2, sum_ball, 0.0))


def fused_loss(pred_cm, gt_cm, nn_cm, n_real, k_knn, k_ball, *,
               w_data, w_smoothness, w_knn, w_ball_q,
               loss_norm_knn, loss_norm_ball):
    B, _, Np = pred_cm.shape
    Ktot = nn_cm.shape[2]
    # Big lane tiles so the nn_cm stream (not per-step overhead) dominates.
    tile = _pick_tile(Np, (4096, 2048, 1024, 512, 256, 128))
    n_tiles = Np // tile

    kernel = functools.partial(
        _loss_kernel,
        k_knn=int(k_knn),
        loss_norm_knn=int(loss_norm_knn), loss_norm_ball=int(loss_norm_ball))

    partials = pl.pallas_call(
        kernel,
        out_shape=jax.ShapeDtypeStruct((B, n_tiles, 8, 128), jnp.float32),
        grid=(B, n_tiles),
        in_specs=[
            pl.BlockSpec((1, 3, tile), lambda b, t: (b, 0, t)),
            pl.BlockSpec((1, 3, tile), lambda b, t: (b, 0, t)),
            pl.BlockSpec((1, 3, Ktot, tile), lambda b, t: (b, 0, 0, t)),
        ],
        out_specs=pl.BlockSpec((1, 1, 8, 128), lambda b, t: (b, t, 0, 0)),
        compiler_params=pltpu.CompilerParams(
            dimension_semantics=("parallel", "parallel")),
    )(pred_cm, gt_cm, nn_cm)

    # Tiny final reduction + weighting on the (B, n_tiles, 3) partial sums.
    sums = partials[:, :, 0, :3]
    sum_data = jnp.sum(sums[..., 0])
    sum_knn = jnp.sum(sums[..., 1])
    sum_ball = jnp.sum(sums[..., 2])

    inv_cnt_data = 1.0 / float(B * n_real * 3)
    inv_cnt_knn = 1.0 / float(B * n_real * k_knn)
    inv_cnt_ball = 1.0 / float(B * n_real * k_ball)
    smooth = (w_knn * sum_knn * inv_cnt_knn
              + w_ball_q * sum_ball * inv_cnt_ball)
    return w_data * sum_data * inv_cnt_data + w_smoothness * smooth


# ----------------------------------------------------------------------------
# Neighbor-index construction (plain JAX glue — data-dependent selection)
# ----------------------------------------------------------------------------
def _knn_indices(d2, k, radius):
    # d2: (B, N, Ncol) squared distances (padded cols are huge, never picked).
    _, idx = jax.lax.top_k(-d2, k)                        # (B, N, k), ascending dist
    knn_d2 = jnp.take_along_axis(d2, idx, axis=-1)
    dist = jnp.sqrt(knn_d2)
    # TODO(synk): the CUDA knn's returned `dist` may be squared; Euclidean used here.
    center = idx[..., 0:1]                                # nearest (self)
    return jnp.where(dist > radius, center, idx)          # (B, N, k)


def _ball_query_indices(d2, k, radius):
    # Emulates pointnet2 query_ball_point: first k indices (in index order)
    # with d2 < radius^2; unfilled slots repeat the first valid index.
    # Keys are unique per column, so top_k of -key == first-k-by-index.
    Ncol = d2.shape[-1]
    mask = d2 < (radius * radius)                         # (B, N, Ncol)
    col = jnp.arange(Ncol, dtype=jnp.int32)
    key = jnp.where(mask, col[None, None, :], Ncol + col[None, None, :])
    _, first_k = jax.lax.top_k(-key, k)                   # O(N*k), not argsort
    first_k = first_k.astype(jnp.int32)                   # (B, N, k)
    count = jnp.sum(mask, axis=-1, keepdims=True)         # (B, N, 1)
    valid = jnp.arange(k, dtype=jnp.int32)[None, None, :] < count
    return jnp.where(valid, first_k, first_k[..., 0:1])


# ----------------------------------------------------------------------------
# Module equivalent
# ----------------------------------------------------------------------------
class SupervisedL1RegLoss:
    def __init__(self, w_data, w_smoothness, smoothness_loss_params, **kwargs):
        self.w_data = list(w_data)
        self.w_smoothness = list(w_smoothness)
        self.w_knn = smoothness_loss_params["w_knn"]
        self.w_ball_q = smoothness_loss_params["w_ball_q"]
        self.knn_params = smoothness_loss_params["knn_loss_params"]
        self.ball_params = smoothness_loss_params["ball_q_loss_params"]

    def __call__(self, pc_source, pc_target, pred_flow, gt_flow, seq_len=0, i=0):
        # TODO(synk): multi-weight get_loss_weights schedule (len(w_data) > 1) not implemented.
        assert len(self.w_data) == 1
        w_data = self.w_data[0]
        w_smoothness = self.w_smoothness[0]

        B, N, _ = pc_source.shape
        kk = self.knn_params["k"]
        kb = self.ball_params["k"]

        d2 = pairwise_sqdist(pc_source)                   # Pallas kernel 1

        knn_idx = _knn_indices(d2, kk, self.knn_params["radius"])
        ball_idx = _ball_query_indices(d2, kb, self.ball_params["radius"])

        # Single combined gather that directly produces the channel-major,
        # lane-dense neighbor-flow tensor (B, 3, Kk+Kb, N). The dominant
        # neighbor stream is written/read in bf16; f32 accumulation in-kernel.
        idx_all = jnp.concatenate([knn_idx, ball_idx], axis=-1)   # (B, N, Ktot)
        idx_t = jnp.transpose(idx_all, (0, 2, 1))                 # (B, Ktot, N)
        flow_cm = jnp.transpose(pred_flow, (0, 2, 1)).astype(jnp.float32)  # (B, 3, N)
        gt_cm = jnp.transpose(gt_flow, (0, 2, 1)).astype(jnp.float32)      # (B, 3, N)
        nn_cm = jnp.take_along_axis(flow_cm.astype(jnp.bfloat16)[:, :, None, :],
                                    idx_t[:, None, :, :], axis=3)  # (B, 3, Ktot, N) bf16

        # Zero-pad the point (lane) axis so padded columns contribute 0.
        Np = _round_up(N, 128)
        if Np != N:
            padw = ((0, 0), (0, 0), (0, Np - N))
            flow_cm = jnp.pad(flow_cm, padw)
            gt_cm = jnp.pad(gt_cm, padw)
            nn_cm = jnp.pad(nn_cm, ((0, 0), (0, 0), (0, 0), (0, Np - N)))

        return fused_loss(                                # Pallas kernel 2
            flow_cm, gt_cm, nn_cm, N, kk, kb,
            w_data=w_data, w_smoothness=w_smoothness,
            w_knn=self.w_knn, w_ball_q=self.w_ball_q,
            loss_norm_knn=self.knn_params["loss_norm"],
            loss_norm_ball=self.ball_params["loss_norm"])


if __name__ == "__main__":
    B, N = 2, 64

    key = jax.random.PRNGKey(0)
    k1, k2, k3, k4 = jax.random.split(key, 4)
    pc_source = jax.random.uniform(k1, (B, N, 3), jnp.float32, -1.0, 1.0)
    pc_target = jax.random.uniform(k2, (B, N, 3), jnp.float32, -1.0, 1.0)  # unused by forward
    pred_flow = 0.1 * jax.random.normal(k3, (B, N, 3), jnp.float32)
    gt_flow = 0.1 * jax.random.normal(k4, (B, N, 3), jnp.float32)

    loss_fn = SupervisedL1RegLoss(
        w_data=[0.75],
        w_smoothness=[0.25],
        smoothness_loss_params=dict(
            w_knn=3.0,
            w_ball_q=1.0,
            knn_loss_params=dict(k=8, radius=0.25, loss_norm=1),
            ball_q_loss_params=dict(k=8, radius=0.75, loss_norm=1),
        ),
    )

    loss = loss_fn(pc_source, pc_target, pred_flow, gt_flow)
    loss = jax.block_until_ready(loss)
    assert loss.shape == () and jnp.isfinite(loss)
    print("KERNEL_OK")
</pallas_src>

<mosaic_0001>
module attributes {stable_mosaic.version = 11 : i64} {
  func.func @_sqdist_kernel(%arg0: i32, %arg1: i32, %arg2: i32, %arg3: memref<1x128x3xf32, #tpu.memory_space<vmem>>, %arg4: memref<1x3x128xf32, #tpu.memory_space<vmem>>, %arg5: memref<1x128x128xf32, #tpu.memory_space<vmem>>) attributes {dimension_semantics = [#tpu.dimension_semantics<parallel>, #tpu.dimension_semantics<parallel>, #tpu.dimension_semantics<parallel>], iteration_bounds = array<i64: 2, 1, 1>, scalar_prefetch = 0 : i64, scratch_operands = 0 : i64, tpu.core_type = #tpu.core_type<tc>, window_params = [{transform_indices = @transform_0, window_bounds = array<i64: 1, 128, 3>}, {transform_indices = @transform_1, window_bounds = array<i64: 1, 3, 128>}, {transform_indices = @transform_2, window_bounds = array<i64: 1, 128, 128>}]} {
    %c0 = arith.constant 0 : index
    %c0_0 = arith.constant 0 : index
    %c0_1 = arith.constant 0 : index
    %0 = vector.load %arg3[%c0, %c0_0, %c0_1] : memref<1x128x3xf32, #tpu.memory_space<vmem>>, vector<1x128x3xf32>
    %1 = vector.shape_cast %0 : vector<1x128x3xf32> to vector<128x3xf32>
    %c0_2 = arith.constant 0 : index
    %c0_3 = arith.constant 0 : index
    %c0_4 = arith.constant 0 : index
    %2 = vector.load %arg4[%c0_2, %c0_3, %c0_4] : memref<1x3x128xf32, #tpu.memory_space<vmem>>, vector<1x3x128xf32>
    %3 = vector.shape_cast %2 : vector<1x3x128xf32> to vector<3x128xf32>
    %4 = vector.extract_strided_slice %1 {offsets = [0, 0], sizes = [128, 1], strides = [1, 1]} : vector<128x3xf32> to vector<128x1xf32>
    %5 = vector.extract_strided_slice %3 {offsets = [0, 0], sizes = [1, 128], strides = [1, 1]} : vector<3x128xf32> to vector<1x128xf32>
    %6 = vector.broadcast %4 : vector<128x1xf32> to vector<128x128xf32>
    %7 = vector.broadcast %5 : vector<1x128xf32> to vector<128x128xf32>
    %8 = arith.subf %6, %7 : vector<128x128xf32>
    %9 = vector.extract_strided_slice %1 {offsets = [0, 1], sizes = [128, 1], strides = [1, 1]} : vector<128x3xf32> to vector<128x1xf32>
    %10 = vector.extract_strided_slice %3 {offsets = [1, 0], sizes = [1, 128], strides = [1, 1]} : vector<3x128xf32> to vector<1x128xf32>
    %11 = vector.broadcast %9 : vector<128x1xf32> to vector<128x128xf32>
    %12 = vector.broadcast %10 : vector<1x128xf32> to vector<128x128xf32>
    %13 = arith.subf %11, %12 : vector<128x128xf32>
    %14 = vector.extract_strided_slice %1 {offsets = [0, 2], sizes = [128, 1], strides = [1, 1]} : vector<128x3xf32> to vector<128x1xf32>
    %15 = vector.extract_strided_slice %3 {offsets = [2, 0], sizes = [1, 128], strides = [1, 1]} : vector<3x128xf32> to vector<1x128xf32>
    %16 = vector.broadcast %14 : vector<128x1xf32> to vector<128x128xf32>
    %17 = vector.broadcast %15 : vector<1x128xf32> to vector<128x128xf32>
    %18 = arith.subf %16, %17 : vector<128x128xf32>
    %19 = arith.mulf %8, %8 : vector<128x128xf32>
    %20 = arith.mulf %13, %13 : vector<128x128xf32>
    %21 = arith.addf %19, %20 : vector<128x128xf32>
    %22 = arith.mulf %18, %18 : vector<128x128xf32>
    %23 = arith.addf %21, %22 : vector<128x128xf32>
    %c0_5 = arith.constant 0 : index
    %c0_6 = arith.constant 0 : index
    %c0_7 = arith.constant 0 : index
    %24 = vector.load %arg5[%c0_5, %c0_6, %c0_7] : memref<1x128x128xf32, #tpu.memory_space<vmem>>, vector<1x128x128xf32>
    %25 = vector.shape_cast %24 : vector<1x128x128xf32> to vector<128x128xf32>
    %26 = vector.shape_cast %23 : vector<128x128xf32> to vector<1x128x128xf32>
    tpu.vector_store %arg5[%c0_5, %c0_6, %c0_7], %26 {strides = array<i32>} : memref<1x128x128xf32, #tpu.memory_space<vmem>>, vector<1x128x128xf32>,
    return
  }
  func.func @transform_0(%arg0: i32, %arg1: i32, %arg2: i32) -> (i32, i32, i32) {
    %c0_i32 = arith.constant 0 : i32
    %c0_i32_0 = arith.constant 0 : i32
    return %arg0, %arg1, %c0_i32 : i32, i32, i32
  }
  func.func @transform_1(%arg0: i32, %arg1: i32, %arg2: i32) -> (i32, i32, i32) {
    %c0_i32 = arith.constant 0 : i32
    %c0_i32_0 = arith.constant 0 : i32
    return %arg0, %c0_i32, %arg2 : i32, i32, i32
  }
  func.func @transform_2(%arg0: i32, %arg1: i32, %arg2: i32) -> (i32, i32, i32) {
    %c0_i32 = arith.constant 0 : i32
    return %arg0, %arg1, %arg2 : i32, i32, i32
  }
}

</mosaic_0001>

<bundles_post_ra>
// kernel: tpu_custom_call.1
= control target key start
LH: loop header
LB: loop body
LE: loop exit
PB: predicated region body
PF: predicated region fallthrough
CT: control target
= control target key end

     0   :  { %7 = vsyncpa [#allocation3], 0  ;;  %s1164_s0 = inlined_call_operand.vmem [shape: f32[2,128,3], index: 0, kind: input, shape index: {}]   ;;  %s1165_s1 = inlined_call_operand.vmem [shape: f32[2,3,128], index: 1, kind: input, shape index: {}]   ;;  %s1166_s2 = inlined_call_operand.hbm [shape: f32[2,128,128], index: 2, kind: output, shape index: {}]  }
   0x1   :  { %9 = vsyncpa [#allocation3 + $0x1], 0  ;;  %s884_s9 = smov 0   ;;  %s886_s10 = smov 0  }
   0x2   :  { %s888_s11 = smov 0   ;;  %s890_s12 = smov 0  }
   0x3   :  { %s892_s13 = smov 0   ;;  %s894_s14 = smov 0  }
   0x4 LB: > { %s699_s15 = sadd.s32 4294967295, %s862_s14   ;;  %s700_s16 = sadd.s32 4294967294, %s862_s14   ;;  %s862_s14 = sphi %s894_s14, %s15_s14   ;;  %s858_s13 = sphi %s892_s13, %s1173_s13   ;;  %s854_s12 = sphi %s890_s12, %s1172_s12   ;;  %s850_s11 = sphi %s888_s11, %s1171_s11   ;;  %s846_s10 = sphi %s886_s10, %s1170_s10   ;;  %s842_s9 = sphi %s884_s9, %s1169_s9  }
   0x5   : > { %s34_s17 = sadd.s32 1, %s858_s13  ;;  %s101_s18 = sadd.s32 1, %s850_s11 }
   0x6   : > { %p36_p0 = scmp.ge.s32.totalorder %s34_s17, 2  ;;  %p111_p1 = scmp.ne.s32.totalorder %s850_s11, %s846_s10 }
   0x7   : > { %p112_p2 = scmp.eq.s32.totalorder %s699_s15, 1  ;;  %p117_p3 = scmp.ne.s32.totalorder %s846_s10, %s842_s9 }
   0x8   : > { %s1175_s17 = smov (%p36_p0, %s34_s17), 0  ;;  %p118_p5 = scmp.eq.s32.totalorder %s700_s16, 1 }
   0x9   : > { %p924_p4 = por %p112_p2, %p111_p1  ;;  %s94_s20 = ssub.s32 %s858_s13, %s1175_s17 }
   0xa   : > { %p703_p6 = scmp.ge.s32.totalorder %s862_s14, 1  ;;  %p99_p7 = scmp.eq.s32.totalorder %s94_s20, 0 }
   0xb   : > { %p931_p8 = por %p118_p5, %p117_p3  ;;  %p159_p9 = scmp.lt.s32.totalorder %s862_s14, 3 }
   0xc   : > { %s937_s22 = scalar_select %p99_p7, %s850_s11, %s101_s18  }
   0xd   : > { %p160_p10 = pnand %p703_p6, %p159_p9 }
   0xe   : > { %p193_p11 = scmp.lt.s32.totalorder (!%p160_p10), %s854_s12, 1  ;;  %s189_s4 = sand.u32 (!%p160_p10), 1, %s846_s10  }
   0xf   : > { %163 = sbr.rel (%p160_p10) target bundleno = 281 (0x119), region = 28  ;;  %s704_s5 = sshll.u32 (!%p160_p10), %s189_s4, 7 }
  0x10   : > { %s1064_s6 = scalar_lea.vmem (!%p160_p10), [#allocation2], %s704_s5  ;;  %s714_s7 = sshll.u32 (!%p160_p10), %s854_s12, 7 }
  0x11   : > { %s597_s16 = scalar_lea.hbm (!%p160_p10), %s1166_s2, %s714_s7  ;;  %s598_s18 = sshll.u32 (!%p160_p10), %s1064_s6, 4  ;;  %s599_s18 = int_to_ptr.vmem [resolvable:$true] %s598_s18 }
  0x12   : > { %s600_s20 = sshll.u32 (!%p160_p10), %s597_s16, 4  ;;  %s601_s20 = int_to_ptr.hbm [resolvable:$true] %s600_s20 }
  0x14   : > { %v864_v0 = vmov 0   ;;  %s941_s23 = scalar_select %p193_p11, %s854_s12, 1  ;;  %v865_v17 = vmov 1   ;;  %v866_v18 = vmov 2  }
  0x15   : > { %777 = vset.pattern.permute.xlu2 %v864_v0  ;;  %776 = vset.pattern.permute.xlu1 %v864_v0  ;;  %s583_s12 = scalar_lea.sflag [#allocation3], %s189_s4 }
  0x16   : > { %775 = vset.pattern.permute.xlu0 %v864_v0  ;;  %s713_s24 = sshll.u32 %s941_s23, 7  ;;  %s707_s28 = sshll.u32 %s941_s23, 2 }
  0x17   : > { %s947_s27 = scalar_lea.vmem %s1164_s0, %s713_s24  ;;  %s208_s3 = scalar_lea.vmem %s1165_s1, %s707_s28 }
  0x18   : > { %v950_v1 = vld [vmem:[%s947_s27 + $0x20] sm:$0xff]  ;;  %v212_v2 = vld [vmem:[%s947_s27 + $0x10] sm:$0xff]  ;;  %v215_v4 = vld [vmem:[%s947_s27 + $0x28] sm:$0xff]  ;;  %s798_s23 = sshra.s32 %s601_s20, 4  ;;  %s799_s23 = int_to_ptr.hbm [resolvable:$true] %s798_s23 }
  0x19   : > { %249 = vperm.xlu2 %777, %v950_v1   ;;  %239 = vperm.xlu1 %776, %v212_v2   ;;  %v210_v3 = vld [vmem:[%s947_s27] sm:$0xff]  ;;  %v213_v5 = vld [vmem:[%s947_s27 + $0x18] sm:$0xff]  ;;  %v211_v6 = vld [vmem:[%s947_s27 + $0x8] sm:$0xff]  ;;  %s800_s24 = scalar_lea.hbm %s799_s23, 128  ;;  %p805_p1 = scmp.lt.s32.totalorder %s799_s23, %s1166_s2 }
  0x1a   : > { %229 = vperm.xlu0 %775, %v210_v3   ;;  %v218_v7 = vld [vmem:[%s947_s27 + $0x40] sm:$0xff]  ;;  %v217_v8 = vld [vmem:[%s947_s27 + $0x38] sm:$0xff]  ;;  %v216_v9 = vld [vmem:[%s947_s27 + $0x30] sm:$0xff]  ;;  %p801_p12 = scmp.ne.s32.totalorder %s799_s23, %s800_s24 }
  0x1b   : > { %v221_v10 = vld [vmem:[%s947_s27 + $0x58] sm:$0xff]  ;;  %v220_v11 = vld [vmem:[%s947_s27 + $0x50] sm:$0xff]  ;;  %v219_v12 = vld [vmem:[%s947_s27 + $0x48] sm:$0xff] }
  0x1c   : > { %v224_v13 = vld [vmem:[%s947_s27 + $0x70] sm:$0xff]  ;;  %v223_v14 = vld [vmem:[%s947_s27 + $0x68] sm:$0xff]  ;;  %v967_v15 = vld [vmem:[%s947_s27 + $0x60] sm:$0xff]  ;;  %p802_p13 = pnand %p801_p12, %p924_p4 }
  0x1d   : > { %v971_v16 = vld [vmem:[%s947_s27 + $0x78] sm:$0xff]  ;;  %v981_v19 = vld [vmem:[%s208_s3] sm:$0x7]  ;;  %s804_s27 = scalar_lea.hbm %s1166_s2, 256 }
  0x1e   : > { %v984_v20 = vperm.slane %v981_v19, 0  ;;  %v1007_v38 = vperm.slane %v981_v19, 1  ;;  %p803_p0 = pneg %p802_p13  ;;  %p806_p2 = scmp.lt.s32.totalorder %s804_s27, %s800_s24 }
  0x20   : > { %p807_p3 = por %p806_p2, %p805_p1 }
  0x21   : > { %254 = vperm.xlu2 %777, %v215_v4   ;;  %244 = vperm.xlu1 %776, %v213_v5  }
  0x22   : > { %234 = vperm.xlu0 %775, %v211_v6   ;;  %p808_p5 = pnand %p807_p3, %p803_p0 }
  0x29   : > { %269 = vperm.xlu2 %777, %v218_v7   ;;  %264 = vperm.xlu1 %776, %v217_v8  }
  0x2a   : > { %259 = vperm.xlu0 %775, %v216_v9  }
  0x31   : > { %284 = vperm.xlu2 %777, %v221_v10   ;;  %279 = vperm.xlu1 %776, %v220_v11  }
  0x32   : > { %274 = vperm.xlu0 %775, %v219_v12  }
  0x39   : > { %299 = vperm.xlu2 %777, %v224_v13   ;;  %294 = vperm.xlu1 %776, %v223_v14  }
  0x3a   : > { %289 = vperm.xlu0 %775, %v967_v15  }
  0x41   : > { %779 = vset.pattern.permute.xlu2 %v865_v17  ;;  %778 = vset.pattern.permute.xlu1 %v865_v17 }
  0x42   : > { %304 = vperm.xlu0 %775, %v971_v16   ;;  %329 = vperm.xlu2 %779, %v211_v6  }
  0x43   : > { %325 = vperm.xlu1 %778, %v210_v3  }
  0x4a   : > { %780 = vset.pattern.permute.xlu0 %v865_v17  ;;  %341 = vperm.xlu2 %779, %v950_v1  }
  0x4b   : > { %337 = vperm.xlu1 %778, %v213_v5   ;;  %333 = vperm.xlu0 %780, %v212_v2  }
  0x52   : > { %349 = vperm.xlu2 %779, %v216_v9  }
  0x53   : > { %345 = vperm.xlu1 %778, %v215_v4   ;;  %353 = vperm.xlu0 %780, %v217_v8  }
  0x5a   : > { %361 = vperm.xlu2 %779, %v219_v12  }
  0x5b   : > { %357 = vperm.xlu1 %778, %v218_v7   ;;  %365 = vperm.xlu0 %780, %v220_v11  }
  0x62   : > { %373 = vperm.xlu2 %779, %v967_v15  }
  0x63   : > { %369 = vperm.xlu1 %778, %v221_v10   ;;  %377 = vperm.xlu0 %780, %v223_v14  }
  0x6a   : > { %385 = vperm.xlu2 %779, %v971_v16  }
  0x6b   : > { %381 = vperm.xlu1 %778, %v224_v13   ;;  %781 = vset.pattern.permute.xlu0 %v866_v18 }
  0x6c   : > { %406 = vperm.xlu0 %781, %v210_v3  }
  0x72   : > { %783 = vset.pattern.permute.xlu2 %v866_v18 }
  0x73   : > { %782 = vset.pattern.permute.xlu1 %v866_v18  ;;  %v250_v21 = vpop.permute.xlu2 %249  ;;  %414 = vperm.xlu2 %783, %v212_v2  }
  0x74   : > { %v312_v22 = vsub.f32 %v250_v21, %v984_v20  ;;  %410 = vperm.xlu1 %782, %v211_v6   ;;  %426 = vperm.xlu0 %781, %v215_v4  }
  0x76   : > { %v490_v52 = vmul.f32 %v312_v22, %v312_v22 }
  0x7b   : > { %v255_v23 = vpop.permute.xlu2 %254  ;;  %422 = vperm.xlu2 %783, %v950_v1  }
  0x7c   : > { %v989_v24 = vsub.f32 %v255_v23, %v984_v20  ;;  %418 = vperm.xlu1 %782, %v213_v5   ;;  %438 = vperm.xlu0 %781, %v218_v7  }
  0x83   : > { %v270_v25 = vpop.permute.xlu2 %269  ;;  %434 = vperm.xlu2 %783, %v217_v8  }
  0x84   : > { %v992_v26 = vsub.f32 %v270_v25, %v984_v20  ;;  %430 = vperm.xlu1 %782, %v216_v9   ;;  %450 = vperm.xlu0 %781, %v221_v10  }
  0x8b   : > { %v285_v27 = vpop.permute.xlu2 %284  ;;  %v994_v28 = vpop.permute.xlu1 %239  ;;  %446 = vperm.xlu2 %783, %v220_v11  }
  0x8c   : > { %v997_v29 = vsub.f32 %v285_v27, %v984_v20  ;;  %442 = vperm.xlu1 %782, %v219_v12   ;;  %462 = vperm.xlu0 %781, %v224_v13   ;;  %v230_v30 = vpop.permute.xlu0 %229 }
  0x8d   : > { %v308_v31 = vsub.f32 %v230_v30, %v984_v20 }
  0x8f   : > { %v486_v7 = vmul.f32 %v308_v31, %v308_v31 }
  0x93   : > { %v300_v32 = vpop.permute.xlu2 %299  ;;  %v245_v33 = vpop.permute.xlu1 %244  ;;  %458 = vperm.xlu2 %783, %v223_v14  }
  0x94   : > { %v1001_v34 = vsub.f32 %v300_v32, %v984_v20  ;;  %v311_v35 = vsub.f32 %v245_v33, %v984_v20  ;;  %454 = vperm.xlu1 %782, %v967_v15   ;;  %v235_v36 = vpop.permute.xlu0 %234 }
  0x95   : > { %v309_v37 = vsub.f32 %v235_v36, %v984_v20 }
  0x96   : > { %v489_v18 = vmul.f32 %v311_v35, %v311_v35 }
  0x97   : > { %v487_v42 = vmul.f32 %v309_v37, %v309_v37  ;;  %v491_v37 = vmul.f32 %v989_v24, %v989_v24 }
  0x9b   : > { %v1009_v39 = vpop.permute.xlu1 %264 }
  0x9c   : > { %466 = vperm.xlu1 %782, %v971_v16   ;;  %v260_v40 = vpop.permute.xlu0 %259  ;;  %v330_v41 = vpop.permute.xlu2 %329 }
  0x9d   : > { %v314_v43 = vsub.f32 %v260_v40, %v984_v20  ;;  %v390_v44 = vsub.f32 %v330_v41, %v1007_v38 }
  0x9f   : > { %v503_v45 = vmul.f32 %v390_v44, %v390_v44  ;;  %v492_v60 = vmul.f32 %v314_v43, %v314_v43  ;;  %v1051_v43 = vperm.slane %v981_v19, 2  ;;  %v310_v44 = vsub.f32 %v994_v28, %v984_v20 }
  0xa1   : > { %v1014_v46 = vadd.f32 %v503_v45, %v487_v42 }
  0xa3   : > { %v1016_v47 = vpop.permute.xlu1 %279 }
  0xa4   : > { %v275_v48 = vpop.permute.xlu0 %274  ;;  %v342_v49 = vpop.permute.xlu2 %341 }
  0xa5   : > { %v317_v50 = vsub.f32 %v275_v48, %v984_v20  ;;  %v393_v51 = vsub.f32 %v342_v49, %v1007_v38 }
  0xa7   : > { %v506_v53 = vmul.f32 %v393_v51, %v393_v51  ;;  %v495_v5 = vmul.f32 %v317_v50, %v317_v50  ;;  %v488_v51 = vmul.f32 %v310_v44, %v310_v44 }
  0xa9   : > { %v1020_v54 = vadd.f32 %v506_v53, %v490_v52  ;;  %v494_v53 = vmul.f32 %v992_v26, %v992_v26  ;;  %v497_v26 = vmul.f32 %v997_v29, %v997_v29 }
  0xab   : > { %v1022_v55 = vpop.permute.xlu1 %294 }
  0xac   : > { %v290_v56 = vpop.permute.xlu0 %289  ;;  %v350_v57 = vpop.permute.xlu2 %349 }
  0xad   : > { %v320_v58 = vsub.f32 %v290_v56, %v984_v20  ;;  %v395_v59 = vsub.f32 %v350_v57, %v1007_v38 }
  0xaf   : > { %v508_v61 = vmul.f32 %v395_v59, %v395_v59  ;;  %v498_v16 = vmul.f32 %v320_v58, %v320_v58 }
  0xb1   : > { %v1026_v62 = vadd.f32 %v508_v61, %v492_v60 }
  0xb4   : > { %v305_v63 = vpop.permute.xlu0 %304  ;;  %v362_v0 = vpop.permute.xlu2 %361 }
  0xb5   : > { %v323_v1 = vsub.f32 %v305_v63, %v984_v20  ;;  %v398_v2 = vsub.f32 %v362_v0, %v1007_v38  ;;  %v326_v3 = vpop.permute.xlu1 %325 }
  0xb6   : > { %v389_v4 = vsub.f32 %v326_v3, %v1007_v38 }
  0xb7   : > { %v511_v6 = vmul.f32 %v398_v2, %v398_v2  ;;  %v501_v33 = vmul.f32 %v323_v1, %v323_v1 }
  0xb8   : > { %v502_v8 = vmul.f32 %v389_v4, %v389_v4 }
  0xb9   : > { %v1031_v9 = vadd.f32 %v511_v6, %v495_v5  ;;  %v315_v5 = vsub.f32 %v1009_v39, %v984_v20 }
  0xba   : > { %v1033_v10 = vadd.f32 %v502_v8, %v486_v7 }
  0xbb   : > { %v493_v29 = vmul.f32 %v315_v5, %v315_v5 }
  0xbc   : > { %v374_v11 = vpop.permute.xlu2 %373 }
  0xbd   : > { %v401_v12 = vsub.f32 %v374_v11, %v1007_v38  ;;  %v338_v13 = vpop.permute.xlu1 %337  ;;  %v334_v14 = vpop.permute.xlu0 %333 }
  0xbe   : > { %v392_v15 = vsub.f32 %v338_v13, %v1007_v38  ;;  %v391_v40 = vsub.f32 %v334_v14, %v1007_v38 }
  0xbf   : > { %v514_v17 = vmul.f32 %v401_v12, %v401_v12 }
  0xc0   : > { %v505_v21 = vmul.f32 %v392_v15, %v392_v15  ;;  %v504_v45 = vmul.f32 %v391_v40, %v391_v40 }
  0xc1   : > { %v1037_v22 = vadd.f32 %v514_v17, %v498_v16  ;;  %v500_v16 = vmul.f32 %v1001_v34, %v1001_v34 }
  0xc2   : > { %v1039_v23 = vadd.f32 %v505_v21, %v489_v18  ;;  %v520_v56 = vadd.f32 %v504_v45, %v488_v51 }
  0xc4   : > { %v386_v25 = vpop.permute.xlu2 %385 }
  0xc5   : > { %v404_v27 = vsub.f32 %v386_v25, %v1007_v38  ;;  %v346_v30 = vpop.permute.xlu1 %345  ;;  %v354_v31 = vpop.permute.xlu0 %353 }
  0xc6   : > { %v394_v32 = vsub.f32 %v346_v30, %v1007_v38  ;;  %v396_v2 = vsub.f32 %v354_v31, %v1007_v38 }
  0xc7   : > { %v517_v36 = vmul.f32 %v404_v27, %v404_v27  ;;  %v318_v27 = vsub.f32 %v1016_v47, %v984_v20 }
  0xc8   : > { %v507_v35 = vmul.f32 %v394_v32, %v394_v32  ;;  %v509_v7 = vmul.f32 %v396_v2, %v396_v2 }
  0xc9   : > { %v1046_v41 = vadd.f32 %v517_v36, %v501_v33  ;;  %v496_v34 = vmul.f32 %v318_v27, %v318_v27 }
  0xca   : > { %v1048_v42 = vadd.f32 %v507_v35, %v491_v37  ;;  %v525_v17 = vadd.f32 %v509_v7, %v493_v29 }
  0xcd   : > { %v358_v48 = vpop.permute.xlu1 %357  ;;  %v366_v49 = vpop.permute.xlu0 %365 }
  0xce   : > { %v397_v50 = vsub.f32 %v358_v48, %v1007_v38  ;;  %v415_v24 = vpop.permute.xlu2 %414 }
  0xcf   : > { %v472_v52 = vsub.f32 %v415_v24, %v1051_v43 }
  0xd0   : > { %v510_v19 = vmul.f32 %v397_v50, %v397_v50  ;;  %v321_v50 = vsub.f32 %v1022_v55, %v984_v20 }
  0xd1   : > { %v536_v57 = vmul.f32 %v472_v52, %v472_v52 }
  0xd2   : > { %v1062_v58 = vadd.f32 %v510_v19, %v494_v53 }
  0xd3   : > { %v552_v28 = vadd.f32 %v536_v57, %v520_v56  ;;  %v499_v57 = vmul.f32 %v321_v50, %v321_v50 }
  0xd5   : > { %568 = vst [vmem:[%s1064_s6 + $0x10] sm:$0xff] %v552_v28  ;;  %v370_v59 = vpop.permute.xlu1 %369  ;;  %v378_v60 = vpop.permute.xlu0 %377 }
  0xd6   : > { %v400_v61 = vsub.f32 %v370_v59, %v1007_v38  ;;  %v423_v63 = vpop.permute.xlu2 %422  ;;  %v402_v45 = vsub.f32 %v378_v60, %v1007_v38 }
  0xd7   : > { %v474_v0 = vsub.f32 %v423_v63, %v1051_v43 }
  0xd8   : > { %v513_v1 = vmul.f32 %v400_v61, %v400_v61  ;;  %v515_v53 = vmul.f32 %v402_v45, %v402_v45 }
  0xd9   : > { %v538_v3 = vmul.f32 %v474_v0, %v474_v0 }
  0xda   : > { %v1072_v4 = vadd.f32 %v513_v1, %v497_v26 }
  0xdb   : > { %v554_v6 = vadd.f32 %v538_v3, %v1020_v54  ;;  %v399_v54 = vsub.f32 %v366_v49, %v1007_v38 }
  0xdd   : > { %570 = vst [vmem:[%s1064_s6 + $0x20] sm:$0xff] %v554_v6  ;;  %v382_v8 = vpop.permute.xlu1 %381  ;;  %v512_v32 = vmul.f32 %v399_v54, %v399_v54 }
  0xde   : > { %v403_v11 = vsub.f32 %v382_v8, %v1007_v38  ;;  %v435_v12 = vpop.permute.xlu2 %434  ;;  %v407_v13 = vpop.permute.xlu0 %406 }
  0xdf   : > { %v477_v14 = vsub.f32 %v435_v12, %v1051_v43  ;;  %v470_v15 = vsub.f32 %v407_v13, %v1051_v43  ;;  %v528_v47 = vadd.f32 %v512_v32, %v496_v34 }
  0xe0   : > { %v516_v39 = vmul.f32 %v403_v11, %v403_v11 }
  0xe1   : > { %v541_v18 = vmul.f32 %v477_v14, %v477_v14  ;;  %v534_v21 = vmul.f32 %v470_v15, %v470_v15 }
  0xe2   : > { %v532_v25 = vadd.f32 %v516_v39, %v500_v16 }
  0xe3   : > { %v557_v30 = vadd.f32 %v541_v18, %v525_v17  ;;  %v550_v31 = vadd.f32 %v534_v21, %v1033_v10 }
  0xe5   : > { %573 = vst [vmem:[%s1064_s6 + $0x38] sm:$0xff] %v557_v30 }
  0xe6   : > { %566 = vst [vmem:[%s1064_s6] sm:$0xff] %v550_v31  ;;  %v447_v33 = vpop.permute.xlu2 %446  ;;  %v411_v36 = vpop.permute.xlu1 %410 }
  0xe7   : > { %v480_v37 = vsub.f32 %v447_v33, %v1051_v43  ;;  %v471_v35 = vsub.f32 %v411_v36, %v1051_v43  ;;  %v427_v40 = vpop.permute.xlu0 %426 }
  0xe8   : > { %v475_v44 = vsub.f32 %v427_v40, %v1051_v43 }
  0xe9   : > { %v544_v10 = vmul.f32 %v480_v37, %v480_v37  ;;  %v535_v48 = vmul.f32 %v471_v35, %v471_v35 }
  0xea   : > { %v539_v49 = vmul.f32 %v475_v44, %v475_v44 }
  0xeb   : > { %v560_v24 = vadd.f32 %v544_v10, %v528_v47  ;;  %v551_v51 = vadd.f32 %v535_v48, %v1014_v46  ;;  %v531_v46 = vadd.f32 %v515_v53, %v499_v57 }
  0xec   : > { %v555_v52 = vadd.f32 %v539_v49, %v1048_v42 }
  0xed   : > { %576 = vst [vmem:[%s1064_s6 + $0x50] sm:$0xff] %v560_v24 }
  0xee   : > { %567 = vst [vmem:[%s1064_s6 + $0x8] sm:$0xff] %v551_v51  ;;  %v459_v19 = vpop.permute.xlu2 %458  ;;  %v419_v56 = vpop.permute.xlu1 %418 }
  0xef   : > { %571 = vst [vmem:[%s1064_s6 + $0x28] sm:$0xff] %v555_v52  ;;  %v483_v38 = vsub.f32 %v459_v19, %v1051_v43  ;;  %v473_v28 = vsub.f32 %v419_v56, %v1051_v43  ;;  %v439_v20 = vpop.permute.xlu0 %438 }
  0xf0   : > { %v478_v55 = vsub.f32 %v439_v20, %v1051_v43 }
  0xf1   : > { %v547_v59 = vmul.f32 %v483_v38, %v483_v38  ;;  %v537_v42 = vmul.f32 %v473_v28, %v473_v28 }
  0xf2   : > { %v542_v60 = vmul.f32 %v478_v55, %v478_v55 }
  0xf3   : > { %v563_v61 = vadd.f32 %v547_v59, %v531_v46  ;;  %v553_v63 = vadd.f32 %v537_v42, %v1039_v23 }
  0xf4   : > { %v558_v0 = vadd.f32 %v542_v60, %v1062_v58 }
  0xf5   : > { %579 = vst [vmem:[%s1064_s6 + $0x68] sm:$0xff] %v563_v61 }
  0xf6   : > { %569 = vst [vmem:[%s1064_s6 + $0x18] sm:$0xff] %v553_v63  ;;  %v431_v26 = vpop.permute.xlu1 %430 }
  0xf7   : > { %574 = vst [vmem:[%s1064_s6 + $0x40] sm:$0xff] %v558_v0  ;;  %v476_v1 = vsub.f32 %v431_v26, %v1051_v43  ;;  %v451_v2 = vpop.permute.xlu0 %450 }
  0xf8   : > { %v481_v3 = vsub.f32 %v451_v2, %v1051_v43 }
  0xf9   : > { %v540_v5 = vmul.f32 %v476_v1, %v476_v1 }
  0xfa   : > { %v545_v6 = vmul.f32 %v481_v3, %v481_v3 }
  0xfb   : > { %v556_v7 = vadd.f32 %v540_v5, %v1026_v62 }
  0xfc   : > { %v561_v8 = vadd.f32 %v545_v6, %v1072_v4 }
  0xfd   : > { %572 = vst [vmem:[%s1064_s6 + $0x30] sm:$0xff] %v556_v7 }
  0xfe   : > { %577 = vst [vmem:[%s1064_s6 + $0x58] sm:$0xff] %v561_v8  ;;  %v443_v23 = vpop.permute.xlu1 %442 }
  0xff   : > { %v479_v58 = vsub.f32 %v443_v23, %v1051_v43  ;;  %v463_v11 = vpop.permute.xlu0 %462 }
 0x100   : > { %v484_v12 = vsub.f32 %v463_v11, %v1051_v43 }
 0x101   : > { %v543_v13 = vmul.f32 %v479_v58, %v479_v58 }
 0x102   : > { %v548_v29 = vmul.f32 %v484_v12, %v484_v12 }
 0x103   : > { %v559_v14 = vadd.f32 %v543_v13, %v1031_v9 }
 0x104   : > { %v564_v15 = vadd.f32 %v548_v29, %v532_v25 }
 0x105   : > { %575 = vst [vmem:[%s1064_s6 + $0x48] sm:$0xff] %v559_v14 }
 0x106   : > { %580 = vst [vmem:[%s1064_s6 + $0x70] sm:$0xff] %v564_v15  ;;  %v455_v62 = vpop.permute.xlu1 %454 }
 0x107   : > { %v482_v4 = vsub.f32 %v455_v62, %v1051_v43 }
 0x109   : > { %v546_v16 = vmul.f32 %v482_v4, %v482_v4 }
 0x10b   : > { %v562_v39 = vadd.f32 %v546_v16, %v1037_v22 }
 0x10d   : > { %578 = vst [vmem:[%s1064_s6 + $0x60] sm:$0xff] %v562_v39 }
 0x10e   : > { %v467_v17 = vpop.permute.xlu1 %466 }
 0x10f   : > { %v485_v9 = vsub.f32 %v467_v17, %v1051_v43 }
 0x111   : > { %v549_v54 = vmul.f32 %v485_v9, %v485_v9 }
 0x113   : > { %v565_v18 = vadd.f32 %v549_v54, %v1046_v41 }
 0x115   : > { %581 = vst [vmem:[%s1064_s6 + $0x78] sm:$0xff] %v565_v18 }
 0x116   : > { %811 = shalt.err (!%p808_p5)
}
 0x117   : > { %s867_s30 = smov 128   ;;  %s868_s3 = smov 8  }
 0x118   : > { %715 = dma.vmem_to_hbm [thread:$0]  (%p924_p4), %s599_s18, 2048, %s601_s20, %s583_s12, %s867_s30, %s867_s30, %s868_s3  }
 0x119 PF: > { %p721_p6 = scmp.ge.s32.totalorder %s862_s14, 2  ;;  %s615_s4 = sand.u32 1, %s842_s9  }
 0x11a   : > { %s616_s5 = scalar_lea.sflag [#allocation3], %s615_s4 }
 0x11b   : > { %p718_p7 = pnand %p721_p6, %p931_p8 }
 0x11d   : > { %p719_p9 = pneg %p718_p7 }
 0x11f   : > { %837 = dma.done.wait (%p719_p9), %s616_s5, 2048  }
 0x120   : > { %839 = vsyncadd (%p719_p9), %s616_s5, 4294965248  ;;  %s15_s14 = sadd.s32 1, %s862_s14   ;;  %s1169_s9 = smov %s846_s10 }
 0x121   : > { %p12_p10 = scmp.ge.s32.totalorder %s15_s14, 4   ;;  %s1170_s10 = smov %s850_s11 }
 0x122   : > { %s1171_s11 = smov %s937_s22  ;;  %s1172_s12 = smov %s858_s13 }
 0x123   : > { %s1173_s13 = smov %s1175_s17  ;;  %14 = sbr.rel (!%p12_p10) target bundleno = 4 (0x4), region = 66 }
 0x128   :  { %622 = vsyncpa [#allocation3], 1 }
 0x129   :  { %624 = vsyncpa [#allocation3 + $0x1], 1 }

</bundles_post_ra>
